<compile_context>
chip_gen: v7x
topology: tpu7x:2x2x1
jax: 0.10.0
libtpu: 0.0.40
codegen_flags: <defaults>
</compile_context>

<pallas_src>
import functools

import jax
import jax.numpy as jnp
from jax.experimental import pallas as pl
from jax.experimental.pallas import tpu as pltpu


def _round_up(a: int, b: int) -> int:
    return (a + b - 1) // b * b


def _gcn_kernel(graph_ref, xw_ref, b_ref, o_ref, acc_ref, *,
                normalize: bool, xw_resident: bool, tile_k: int, compute_dtype):
    k = pl.program_id(1)

    @pl.when(k == 0)
    def _():
        acc_ref[...] = jnp.zeros_like(acc_ref)

    # Adjacency tile is cast in-kernel (wrapper never copies the N x N array).
    g = graph_ref[...].astype(compute_dtype)

    if xw_resident:
        # Full (padded) xw lives in VMEM once; slice out the current K-slab.
        k0 = pl.multiple_of(k * tile_k, tile_k)
        xw = xw_ref[pl.ds(k0, tile_k), :]
    else:
        xw = xw_ref[...]

    # Partial aggregation: (tile_n, tile_k) @ (tile_k, C_out_p), f32 accumulate.
    acc_ref[...] += jnp.dot(g, xw, preferred_element_type=jnp.float32)

    @pl.when(k == pl.num_programs(1) - 1)
    def _():
        out = acc_ref[...] + b_ref[...]
        if normalize:
            # F.normalize(p=2, dim=-1): x / max(||x||, 1e-12) == x * rsqrt(max(ss, 1e-24))
            ss = jnp.sum(out * out, axis=-1, keepdims=True)
            out = out * jax.lax.rsqrt(jnp.maximum(ss, 1e-24))
        o_ref[...] = out.astype(o_ref.dtype)


def gcn_conv(
    x,
    graph,
    weight,
    bias=None,
    *,
    normalize: bool = False,
    tile_n: int = 512,            # clamped to the problem; keep >= 512 on all gens
    tile_k: int = 1024,
    compute_dtype=jnp.bfloat16,   # streaming/MXU dtype; accumulation is always f32
    out_dtype=jnp.float32,
    vmem_limit_bytes=None,        # None -> compiler default (safe on v7x's 64 MiB)
    xw_resident_budget_bytes: int = 8 * 1024 * 1024,
):
    """GCNConv forward: lin(graph @ x), optionally L2-normalized along features.

    x:      [N, C_in]
    graph:  [N, N]        (streamed in its own dtype; cast to compute_dtype in-kernel)
    weight: [C_out, C_in] (PyTorch Linear convention)
    bias:   [C_out] or None
    returns [N, C_out]    (out_dtype)
    """
    N, C_in = x.shape
    C_out, C_in_w = weight.shape
    assert C_in_w == C_in
    assert graph.shape == (N, N)

    # Clamp tiles to the (padded) problem and check TPU tiling constraints.
    tile_n = min(tile_n, _round_up(N, 8))      # sublane dim of graph/output blocks
    tile_k = min(tile_k, _round_up(N, 128))    # lane dim of graph / sublane dim of xw
    assert tile_n % 8 == 0 and tile_k % 128 == 0

    n_rows = _round_up(N, tile_n)
    n_k = _round_up(N, tile_k)
    c_out_p = _round_up(C_out, 128)            # full-width (unmasked) output stores

    # Adjacency: no dtype cast in the wrapper; pad only if tiles don't divide N.
    if n_rows == N and n_k == N:
        graph_p = graph
    else:
        graph_p = jnp.pad(graph, ((0, n_rows - N), (0, n_k - N)))

    # Algebraic reorder: xw = x @ W^T (tiny matmul, f32), aggregated by the kernel.
    xw = jnp.dot(x.astype(jnp.float32), weight.T.astype(jnp.float32))
    xw_p = jnp.pad(xw, ((0, n_k - N), (0, c_out_p - C_out))).astype(compute_dtype)

    b = jnp.zeros((C_out,), jnp.float32) if bias is None else bias.astype(jnp.float32)
    b_p = jnp.pad(b, (0, c_out_p - C_out)).reshape(1, c_out_p)

    # Keep the whole (padded) xw resident in VMEM when it is small enough, so it
    # is DMA'd once instead of once per output row tile.
    xw_bytes = n_k * c_out_p * jnp.dtype(compute_dtype).itemsize
    xw_resident = xw_bytes <= xw_resident_budget_bytes
    if xw_resident:
        xw_spec = pl.BlockSpec((n_k, c_out_p), lambda i, k: (0, 0))
    else:
        xw_spec = pl.BlockSpec((tile_k, c_out_p), lambda i, k: (k, 0))

    kernel = functools.partial(
        _gcn_kernel,
        normalize=normalize,
        xw_resident=xw_resident,
        tile_k=tile_k,
        compute_dtype=compute_dtype,
    )

    cp_kwargs = dict(dimension_semantics=("parallel", "arbitrary"))
    if vmem_limit_bytes is not None:
        cp_kwargs["vmem_limit_bytes"] = vmem_limit_bytes

    out_p = pl.pallas_call(
        kernel,
        out_shape=jax.ShapeDtypeStruct((n_rows, c_out_p), out_dtype),
        grid_spec=pltpu.PrefetchScalarGridSpec(
            num_scalar_prefetch=0,
            grid=(n_rows // tile_n, n_k // tile_k),
            in_specs=[
                pl.BlockSpec((tile_n, tile_k), lambda i, k: (i, k)),   # graph tile
                xw_spec,                                               # xw (resident or K-tiled)
                pl.BlockSpec((1, c_out_p), lambda i, k: (0, 0)),       # bias (padded)
            ],
            out_specs=pl.BlockSpec((tile_n, c_out_p), lambda i, k: (i, 0)),
            scratch_shapes=[pltpu.VMEM((tile_n, c_out_p), jnp.float32)],  # f32 accumulator
        ),
        compiler_params=pltpu.CompilerParams(**cp_kwargs),
    )(graph_p, xw_p, b_p)

    return out_p[:N, :C_out]


def _glorot(key, shape):
    # torch_geometric-style glorot: uniform(-a, a), a = sqrt(6 / (fan_in + fan_out))
    fan_out, fan_in = shape
    a = jnp.sqrt(6.0 / (fan_in + fan_out))
    return jax.random.uniform(key, shape, jnp.float32, minval=-a, maxval=a)


def _reference(x, graph, weight, bias, normalize=False, compute_dtype=jnp.float32):
    # compute_dtype=f32 -> pure float32 reference (torch semantics).
    # compute_dtype=bf16 -> emulates the kernel's streaming rounding of graph/xw.
    xw = x.astype(jnp.float32) @ weight.T.astype(jnp.float32)
    g = graph.astype(compute_dtype).astype(jnp.float32)
    xw = xw.astype(compute_dtype).astype(jnp.float32)
    out = g @ xw + bias
    if normalize:
        ss = jnp.sum(out * out, axis=-1, keepdims=True)
        out = out * jax.lax.rsqrt(jnp.maximum(ss, 1e-24))
    return out


if __name__ == "__main__":
    key = jax.random.PRNGKey(0)
    k_xa, k_ga, k_wa, k_xb, k_gb, k_wb = jax.random.split(key, 6)

    # --- Config A: divisible N (zero-copy graph path), 2x2 grid, f32 compute ---
    Na, Cia, Coa = 256, 32, 64
    xa = jax.random.normal(k_xa, (Na, Cia), jnp.float32)
    ga = jax.random.normal(k_ga, (Na, Na), jnp.float32)
    wa = _glorot(k_wa, (Coa, Cia))
    ba = jnp.zeros((Coa,), jnp.float32)   # module init: glorot weight, zero bias

    out_a = jax.block_until_ready(
        gcn_conv(xa, ga, wa, ba, normalize=False, tile_n=128, tile_k=128,
                 compute_dtype=jnp.float32)
    )
    ref_a = _reference(xa, ga, wa, ba, normalize=False)
    assert out_a.shape == (Na, Coa)
    assert jnp.allclose(out_a, ref_a, atol=1e-3, rtol=1e-3)

    out_an = jax.block_until_ready(
        gcn_conv(xa, ga, wa, ba, normalize=True, tile_n=128, tile_k=128,
                 compute_dtype=jnp.float32)
    )
    ref_an = _reference(xa, ga, wa, ba, normalize=True)
    assert jnp.allclose(out_an, ref_an, atol=1e-3, rtol=1e-3)

    # Also exercise the non-resident (K-tiled) xw fallback path.
    out_af = jax.block_until_ready(
        gcn_conv(xa, ga, wa, ba, normalize=False, tile_n=128, tile_k=128,
                 compute_dtype=jnp.float32, xw_resident_budget_bytes=0)
    )
    assert jnp.allclose(out_af, ref_a, atol=1e-3, rtol=1e-3)

    # --- Config B: ragged N (padding path), default tiles, bf16 streaming ---
    Nb, Cib, Cob = 200, 48, 96
    xb = jax.random.normal(k_xb, (Nb, Cib), jnp.float32)
    gb = jax.random.normal(k_gb, (Nb, Nb), jnp.float32)
    wb = _glorot(k_wb, (Cob, Cib))
    bb = jnp.zeros((Cob,), jnp.float32)

    out_b = jax.block_until_ready(gcn_conv(xb, gb, wb, bb, normalize=True))
    assert out_b.shape == (Nb, Cob)
    # Tight check vs a reference matching the kernel's bf16 streaming numerics.
    ref_b_bf16 = _reference(xb, gb, wb, bb, normalize=True, compute_dtype=jnp.bfloat16)
    assert jnp.allclose(out_b, ref_b_bf16, atol=1e-3, rtol=1e-3)
    # Loose check vs the pure-f32 (torch-equivalent) reference to bound bf16 drift.
    ref_b_f32 = _reference(xb, gb, wb, bb, normalize=True)
    assert jnp.allclose(out_b, ref_b_f32, atol=5e-2, rtol=5e-2)

    print("KERNEL_OK")
</pallas_src>

<mosaic_0001>
module attributes {stable_mosaic.version = 11 : i64} {
  func.func @_gcn_kernel(%arg0: i32, %arg1: i32, %arg2: memref<128x128xf32, #tpu.memory_space<vmem>>, %arg3: memref<256x128xf32, #tpu.memory_space<vmem>>, %arg4: memref<1x128xf32, #tpu.memory_space<vmem>>, %arg5: memref<128x128xf32, #tpu.memory_space<vmem>>, %arg6: memref<128x128xf32, #tpu.memory_space<vmem>>) attributes {dimension_semantics = [#tpu.dimension_semantics<parallel>, #tpu.dimension_semantics<arbitrary>], iteration_bounds = array<i64: 2, 2>, scalar_prefetch = 0 : i64, scratch_operands = 1 : i64, tpu.core_type = #tpu.core_type<tc>, window_params = [{transform_indices = @transform_0, window_bounds = array<i64: 128, 128>}, {pipeline_mode = #tpu.pipeline_mode<synchronous>, transform_indices = @transform_1, window_bounds = array<i64: 256, 128>}, {pipeline_mode = #tpu.pipeline_mode<synchronous>, transform_indices = @transform_2, window_bounds = array<i64: 1, 128>}, {transform_indices = @transform_3, window_bounds = array<i64: 128, 128>}]} {
    %c0_i32 = arith.constant 0 : i32
    %0 = arith.cmpi eq, %arg1, %c0_i32 : i32
    %1 = arith.extui %0 : i1 to i32
    %c0_i32_0 = arith.constant 0 : i32
    %2 = arith.cmpi ne, %1, %c0_i32_0 : i32
    scf.if %2 {
      %cst_8 = arith.constant 0.000000e+00 : f32
      %15 = vector.broadcast %cst_8 : f32 to vector<128x128xf32>
      %c0_9 = arith.constant 0 : index
      %c0_10 = arith.constant 0 : index
      %16 = vector.load %arg6[%c0_9, %c0_10] : memref<128x128xf32, #tpu.memory_space<vmem>>, vector<128x128xf32>
      tpu.vector_store %arg6[%c0_9, %c0_10], %15 {strides = array<i32>} : memref<128x128xf32, #tpu.memory_space<vmem>>, vector<128x128xf32>,
    } else {
    }
    %c0 = arith.constant 0 : index
    %c0_1 = arith.constant 0 : index
    %3 = vector.load %arg2[%c0, %c0_1] : memref<128x128xf32, #tpu.memory_space<vmem>>, vector<128x128xf32>
    %c128_i32 = arith.constant 128 : i32
    %4 = arith.muli %arg1, %c128_i32 : i32
    %5 = tpu.assume_multiple %4, 128 : i32
    %6 = arith.index_cast %5 : i32 to index
    %c0_2 = arith.constant 0 : index
    %7 = vector.load %arg3[%6, %c0_2] : memref<256x128xf32, #tpu.memory_space<vmem>>, vector<128x128xf32>
    %c0_3 = arith.constant 0 : index
    %c0_4 = arith.constant 0 : index
    %8 = vector.load %arg6[%c0_3, %c0_4] : memref<128x128xf32, #tpu.memory_space<vmem>>, vector<128x128xf32>
    %cst = arith.constant dense<0.000000e+00> : vector<128x128xf32>
    %9 = tpu.matmul %3, %7, %cst {dimension_numbers = #tpu.dot_dimension_numbers<[1], [0], [0], [1], [0, 0, 1, 1], [], []>} : vector<128x128xf32>, vector<128x128xf32>, vector<128x128xf32> -> vector<128x128xf32>
    %10 = arith.addf %8, %9 : vector<128x128xf32>
    %c0_5 = arith.constant 0 : index
    %c0_6 = arith.constant 0 : index
    %11 = vector.load %arg6[%c0_5, %c0_6] : memref<128x128xf32, #tpu.memory_space<vmem>>, vector<128x128xf32>
    tpu.vector_store %arg6[%c0_5, %c0_6], %10 {strides = array<i32>} : memref<128x128xf32, #tpu.memory_space<vmem>>, vector<128x128xf32>,
    %c1_i32 = arith.constant 1 : i32
    %12 = arith.cmpi eq, %arg1, %c1_i32 : i32
    %13 = arith.extui %12 : i1 to i32
    %c0_i32_7 = arith.constant 0 : i32
    %14 = arith.cmpi ne, %13, %c0_i32_7 : i32
    scf.if %14 {
      %c0_8 = arith.constant 0 : index
      %c0_9 = arith.constant 0 : index
      %15 = vector.load %arg6[%c0_8, %c0_9] : memref<128x128xf32, #tpu.memory_space<vmem>>, vector<128x128xf32>
      %c0_10 = arith.constant 0 : index
      %c0_11 = arith.constant 0 : index
      %16 = vector.load %arg4[%c0_10, %c0_11] : memref<1x128xf32, #tpu.memory_space<vmem>>, vector<1x128xf32>
      %17 = vector.broadcast %16 : vector<1x128xf32> to vector<128x128xf32>
      %18 = arith.addf %15, %17 : vector<128x128xf32>
      %c0_12 = arith.constant 0 : index
      %c0_13 = arith.constant 0 : index
      %19 = vector.load %arg5[%c0_12, %c0_13] : memref<128x128xf32, #tpu.memory_space<vmem>>, vector<128x128xf32>
      tpu.vector_store %arg5[%c0_12, %c0_13], %18 {strides = array<i32>} : memref<128x128xf32, #tpu.memory_space<vmem>>, vector<128x128xf32>,
    } else {
    }
    return
  }
  func.func @transform_0(%arg0: i32, %arg1: i32) -> (i32, i32) {
    %c0_i32 = arith.constant 0 : i32
    return %arg0, %arg1 : i32, i32
  }
  func.func @transform_1(%arg0: i32, %arg1: i32) -> (i32, i32) {
    %c0_i32 = arith.constant 0 : i32
    %c0_i32_0 = arith.constant 0 : i32
    %c0_i32_1 = arith.constant 0 : i32
    return %c0_i32, %c0_i32_0 : i32, i32
  }
  func.func @transform_2(%arg0: i32, %arg1: i32) -> (i32, i32) {
    %c0_i32 = arith.constant 0 : i32
    %c0_i32_0 = arith.constant 0 : i32
    %c0_i32_1 = arith.constant 0 : i32
    return %c0_i32, %c0_i32_0 : i32, i32
  }
  func.func @transform_3(%arg0: i32, %arg1: i32) -> (i32, i32) {
    %c0_i32 = arith.constant 0 : i32
    %c0_i32_0 = arith.constant 0 : i32
    return %arg0, %c0_i32 : i32, i32
  }
}

</mosaic_0001>

<bundles_post_ra>
// kernel: tpu_custom_call.1
= control target key start
LH: loop header
LB: loop body
LE: loop exit
PB: predicated region body
PF: predicated region fallthrough
CT: control target
= control target key end

     0   :  { %s1468_s0 = inlined_call_operand.hbm [shape: f32[256,256], index: 0, kind: input, shape index: {}]   ;;  %s1469_s1 = inlined_call_operand.hbm [shape: f32[256,128], index: 1, kind: input, shape index: {}]   ;;  %s1470_s2 = inlined_call_operand.vmem [shape: f32[1,128], index: 2, kind: input, shape index: {}]   ;;  %s1471_s3 = inlined_call_operand.hbm [shape: f32[256,128], index: 3, kind: output, shape index: {}]  }
   0x1   :  { %1485 = sst [smem:[#allocation17_spill]] %s1469_s1 }
   0x2   :  { %8 = vsyncpa [#allocation4], 0 }
   0x3   :  { %10 = vsyncpa [#allocation4 + $0x1], 0 }
   0x4   :  { %11 = vsyncpa [#allocation7], 0 }
   0x5   :  { %12 = vsyncpa [#allocation5], 0 }
   0x6   :  { %14 = vsyncpa [#allocation5 + $0x1], 0  ;;  %s1134_s12 = smov 0   ;;  %s1136_s13 = smov 0  }
   0x7   :  { %s1138_s14 = smov 0   ;;  %s1140_s15 = smov 0  }
   0x8   :  { %s1142_s16 = smov 0   ;;  %s1144_s17 = smov 0  }
   0x9   :  { %s1146_s18 = smov 0   ;;  %s1148_s19 = smov 0  }
   0xa   :  { %s1150_s20 = smov 0   ;;  %s1152_s21 = smov 0  }
   0xb   :  { %s1154_s22 = smov 0  }
   0xc LB: > { %1486 = sst [smem:[#allocation12_spill]] %s1063_s12  ;;  %s640_s23 = sadd.s32 4294967295, %s1103_s22   ;;  %s1103_s22 = sphi %s1154_s22, %s20_s22   ;;  %s1099_s21 = sphi %s1152_s21, %s1522_s21   ;;  %s1095_s20 = sphi %s1150_s20, %s1513_s20   ;;  %s1091_s19 = sphi %s1148_s19, %s1521_s19   ;;  %s1087_s18 = sphi %s1146_s18, %s1512_s18   ;;  %s1083_s17 = sphi %s1144_s17, %s1520_s17   ;;  %s1079_s16 = sphi %s1142_s16, %s1519_s16   ;;  %s1075_s15 = sphi %s1140_s15, %s1518_s15   ;;  %s1071_s14 = sphi %s1138_s14, %s1517_s14   ;;  %s1067_s13 = sphi %s1136_s13, %s1516_s13   ;;  %s1063_s12 = sphi %s1134_s12, %s1515_s12  }
   0xd   : > { %1487 = sst [smem:[#allocation13_spill]] %s1095_s20  ;;  %s641_s24 = sadd.s32 4294967294, %s1103_s22  }
   0xe   : > { %p48_p0 = scmp.ne.s32.totalorder %s1083_s17, %s1079_s16  ;;  %p49_p1 = scmp.eq.s32.totalorder %s1103_s22, 0 }
   0xf   : > { %p54_p2 = scmp.ne.s32.totalorder %s1079_s16, %s1075_s15  ;;  %p1194_p3 = scmp.eq.s32.totalorder %s640_s23, 0 }
  0x10   : > { %p1199_p4 = por %p49_p1, %p48_p0  ;;  %p119_p5 = scmp.ne.s32.totalorder %s1071_s14, %s1067_s13 }
  0x11   : > { %s1488_s26 = scalar_select %p1194_p3, 1, 0 }
  0x12   : > { %p1207_p6 = por %p1194_p3, %p54_p2  ;;  %p120_p7 = scmp.eq.s32.totalorder %s640_s23, 3 }
  0x13   : > { %p125_p8 = scmp.ne.s32.totalorder %s1067_s13, %s1063_s12  ;;  %p126_p9 = scmp.eq.s32.totalorder %s641_s24, 3 }
  0x14   : > { %s1490_s29 = scalar_select %p1207_p6, 1, 0 }
  0x15   : > { %p1213_p10 = por %p120_p7, %p119_p5  ;;  %p642_p11 = scmp.ge.s32.totalorder %s1103_s22, 1 }
  0x16   : > { %p1218_p12 = por %p126_p9, %p125_p8  ;;  %p133_p13 = scmp.lt.s32.totalorder %s1103_s22, 5 }
  0x17   : > { %s1491_s30 = scalar_select %p1213_p10, 1, 0 }
  0x18   : > { %s1492_s4 = scalar_select %p1218_p12, 1, 0 }
  0x19   : > { %p1223_p0 = pnand %p642_p11, %p133_p13  ;;  %s1105_s6 = smov [#allocation6]  }
  0x1a   : > { %1493 = sst [smem:[#allocation14_spill]] %s1492_s4  ;;  %s145_s7 = sshll.u32 %s1105_s6, 4  ;;  %s146_s7 = int_to_ptr.vmem [resolvable:$true] %s145_s7 }
  0x1b   : > { %s1494_s5 = scalar_select %p1223_p0, 1, 0 }
  0x1c   : > { %p808_p1 = pneg %p1223_p0  ;;  %p821_p2 = scmp.lt.s32.totalorder %s1103_s22, 4 }
  0x1d   : > { %s1497_s1 = sld [smem:[#allocation17_spill]] }
  0x1e   : > { %p1232_p5 = pnand %p808_p1, %p1194_p3  ;;  %p1238_p7 = pnand %p821_p2, %p1199_p4 }
  0x20   : > { %s1496_s9 = scalar_select %p1238_p7, 1, 0 }
  0x21   : > { %p921_p9 = pneg %p1232_p5 }
  0x23   : > { %s919_s15 = scalar_lea.hbm %s1497_s1, 4096 }
  0x24   : > { %p920_p8 = scmp.ne.s32.totalorder %s1497_s1, %s919_s15  ;;  %p926_p1 = scmp.lt.u32.totalorder %s919_s15, %s1497_s1 }
  0x26   : > { %p922_p11 = pnand %p921_p9, %p920_p8 }
  0x28   : > { %p923_p13 = pneg %p922_p11 }
  0x2a   : > { %p928_p4 = pnand %p926_p1, %p923_p13 }
  0x2c   : > { %931 = shalt.err (!%p928_p4)
}
  0x2d   : > { %s932_s28 = scalar_lea.vmem %s146_s7, 4096  ;;  %p940_p3 = scmp.lt.s32.totalorder %s146_s7, %s146_s7 }
  0x2e   : > { %p933_p2 = scmp.ne.s32.totalorder %s146_s7, %s932_s28  ;;  %p941_p6 = scmp.lt.s32.totalorder %s932_s28, %s932_s28 }
  0x30   : > { %p935_p12 = pnand %p933_p2, %p921_p9  ;;  %p942_p0 = por %p941_p6, %p940_p3 }
  0x32   : > { %p936_p10 = pneg %p935_p12 }
  0x34   : > { %p943_p7 = pnand %p942_p0, %p936_p10 }
  0x36   : > { %946 = shalt.err (!%p943_p7)
}
  0x37   : > { %s1479_s10 = smov 128   ;;  %s1480_s25 = smov 8  }
  0x38   : > { %811 = dma.hbm_to_vmem [thread:$0]  (!%p1232_p5), %s1497_s1, 4096, %s146_s7, [#allocation7], %s1479_s10, %s1479_s10, %s1480_s25  }
  0x39   : > { %s29_s23 = sadd.s32 1, %s1095_s20  ;;  %s32_s24 = sadd.s32 1, %s1099_s21 }
  0x3a   : > { %p30_p3 = scmp.ge.s32.totalorder %s29_s23, 2  ;;  %s162_s6 = sand.u32 1, %s1083_s17  }
  0x3b   : > { %s645_s28 = sshll.u32 %s162_s6, 7  ;;  %s662_s27 = sshll.u32 %s1099_s21, 5 }
  0x3c   : > { %s1524_s23 = smov (%p30_p3, %s29_s23), 0  ;;  %s1526_s24 = smov (!%p30_p3, %s32_s24), %s1099_s21 }
  0x3d   : > { %1498 = sst [smem:[#allocation15_spill]] %s1524_s23  ;;  %s37_s8 = ssub.s32 %s1095_s20, %s1524_s23 }
  0x3e   : > { %p34_p6 = scmp.ge.s32.totalorder %s1526_s24, 2  ;;  %s172_s4 = sadd.s32 %s1095_s20, %s662_s27 }
  0x3f   : > { %s166_s7 = scalar_lea.vmem [#allocation3], %s645_s28  ;;  %s648_s15 = sshll.u32 %s172_s4, 7 }
  0x40   : > { %s175_s11 = sshll.u32 %s166_s7, 4  ;;  %s1528_s24 = smov (%p34_p6, %s1526_s24), 0  ;;  %s1273_s11 = int_to_ptr.vmem [resolvable:$true] %s175_s11 }
  0x41   : > { %1499 = sst [smem:[#allocation16_spill]] %s1528_s24  ;;  %s36_s10 = ssub.s32 %s1099_s21, %s1528_s24 }
  0x42   : > { %s1280_s12 = scalar_lea.hbm %s1468_s0, %s648_s15  ;;  %s38_s27 = sor.u32 %s37_s8, %s36_s10 }
  0x43   : > { %p107_p10 = scmp.eq.s32.totalorder %s36_s10, 0  ;;  %p39_p12 = scmp.eq.s32.totalorder %s38_s27, 0 }
  0x44   : > { %s1500_s28 = sadd.s32 1, %s1071_s14  ;;  %s1501_s23 = sadd.s32 1, %s1083_s17 }
  0x45   : > { %s1285_s7 = scalar_select %p107_p10, %s1071_s14, %s1500_s28  }
  0x46   : > { %s1290_s4 = scalar_select %p39_p12, %s1083_s17, %s1501_s23  }
  0x47   : > { %s1292_s20 = scalar_lea.sflag [#allocation4], %s162_s6  ;;  %s947_s24 = scalar_lea.hbm %s1280_s12, 2048 }
  0x48   : > { %p948_p0 = scmp.ne.s32.totalorder %s1280_s12, %s947_s24  ;;  %p1502_p5 = scmp.ne.s32.totalorder %s1496_s9, 0 }
  0x49   : > { %s952_s10 = scalar_lea.hbm %s1468_s0, 8192  ;;  %p953_p11 = scmp.lt.u32.totalorder %s1280_s12, %s1468_s0 }
  0x4a   : > { %p949_p7 = pneg %p1502_p5  ;;  %p954_p13 = scmp.lt.u32.totalorder %s952_s10, %s947_s24 }
  0x4b   : > { %p956_p4 = scmp.lt.u32.totalorder %s947_s24, %s1280_s12 }
  0x4c   : > { %p950_p8 = pnand %p949_p7, %p948_p0  ;;  %p955_p1 = por %p954_p13, %p953_p11 }
  0x4e   : > { %p951_p9 = pneg %p950_p8  ;;  %p957_p2 = por %p956_p4, %p955_p1 }
  0x50   : > { %p958_p3 = pnand %p957_p2, %p951_p9 }
  0x52   : > { %961 = shalt.err (!%p958_p3)
}
  0x53   : > { %s962_s23 = scalar_lea.vmem %s1273_s11, 2048  ;;  %s1108_s6 = smov [#allocation3]  }
  0x54   : > { %p963_p6 = scmp.ne.s32.totalorder %s1273_s11, %s962_s23  ;;  %s967_s27 = sshll.u32 %s1108_s6, 4  ;;  %s968_s27 = int_to_ptr.vmem [resolvable:$false] %s967_s27 }
  0x55   : > { %s969_s28 = scalar_lea.vmem %s968_s27, 4096  ;;  %p970_p0 = scmp.lt.s32.totalorder %s1273_s11, %s968_s27 }
  0x56   : > { %p965_p10 = pnand %p963_p6, %p949_p7  ;;  %p971_p8 = scmp.lt.s32.totalorder %s969_s28, %s962_s23 }
  0x58   : > { %p966_p12 = pneg %p965_p10  ;;  %p972_p11 = por %p971_p8, %p970_p0 }
  0x5a   : > { %p973_p13 = pnand %p972_p11, %p966_p12 }
  0x5c   : > { %976 = shalt.err (!%p973_p13)
}
  0x5d   : > { %s1109_s24 = smov 256   ;;  %s1503_s1 = smov 8  }
  0x5e   : > { %s1504_s25 = smov 128   ;;  %p1505_p7 = scmp.ne.s32.totalorder %s1494_s5, 0 }
  0x5f   : > { %815 = dma.hbm_to_vmem [thread:$0]  (!%p1502_p5), %s1280_s12, 2048, %s1273_s11, %s1292_s20, %s1109_s24, %s1504_s25, %s1503_s1  }
  0x60   : > { %187 = sbr.rel (%p1505_p7) target bundleno = 419 (0x1a3), region = 32  ;;  %s189_s10 = sand.u32 (!%p1505_p7), 1, %s1079_s16  }
  0x61   : > { %s650_s8 = sshll.u32 (!%p1505_p7), %s189_s10, 7  ;;  %s190_s15 = scalar_lea.sflag (!%p1505_p7), [#allocation4], %s189_s10 }
  0x62   : > { %s1325_s23 = scalar_lea.vmem (!%p1505_p7), [#allocation3], %s650_s8  ;;  %p1506_p9 = scmp.ne.s32.totalorder (!%p1505_p7), %s1490_s29, 0 }
  0x67   : > { %1050 = dma.done.wait (%p1506_p9), %s190_s15, 2048  }
  0x68   : > { %1052 = vsyncadd (%p1506_p9), %s190_s15, 4294965248  ;;  %p1507_p1 = scmp.ne.s32.totalorder %s1488_s26, 0 }
  0x6a   : > { %1054 = dma.done.wait (%p1507_p1), [#allocation7], 4096  }
  0x6b   : > { %1056 = vsyncadd (%p1507_p1), [#allocation7], 4294963200  ;;  %s217_s12 = sand.u32 1, %s1067_s13   ;;  %p653_p5 = scmp.ne.s32.totalorder %s1087_s18, 0 }
  0x6c   : > { %s652_s20 = sshll.u32 %s217_s12, 7  ;;  %v1110_v0 = vmov (!%p653_p5), 0.0  }
  0x6d   : > { %s1338_s5 = scalar_lea.vmem [#allocation8], %s652_s20  ;;  %225 = sbr.rel (%p653_p5) target bundleno = 117 (0x75), region = 44  ;;  %226 = vst [vmem:[#allocation2] sm:$0xff] (!%p653_p5), %v1110_v0  ;;  %227 = vst [vmem:[#allocation2 + $0x8] sm:$0xff] (!%p653_p5), %v1110_v0 }
  0x6e   : > { %228 = vst [vmem:[#allocation2 + $0x10] sm:$0xff] (!%p653_p5), %v1110_v0  ;;  %229 = vst [vmem:[#allocation2 + $0x18] sm:$0xff] (!%p653_p5), %v1110_v0 }
  0x6f   : > { %230 = vst [vmem:[#allocation2 + $0x20] sm:$0xff] (!%p653_p5), %v1110_v0  ;;  %231 = vst [vmem:[#allocation2 + $0x28] sm:$0xff] (!%p653_p5), %v1110_v0 }
  0x70   : > { %232 = vst [vmem:[#allocation2 + $0x30] sm:$0xff] (!%p653_p5), %v1110_v0  ;;  %233 = vst [vmem:[#allocation2 + $0x38] sm:$0xff] (!%p653_p5), %v1110_v0 }
  0x71   : > { %234 = vst [vmem:[#allocation2 + $0x40] sm:$0xff] (!%p653_p5), %v1110_v0  ;;  %235 = vst [vmem:[#allocation2 + $0x48] sm:$0xff] (!%p653_p5), %v1110_v0 }
  0x72   : > { %236 = vst [vmem:[#allocation2 + $0x50] sm:$0xff] (!%p653_p5), %v1110_v0  ;;  %237 = vst [vmem:[#allocation2 + $0x58] sm:$0xff] (!%p653_p5), %v1110_v0 }
  0x73   : > { %238 = vst [vmem:[#allocation2 + $0x60] sm:$0xff] (!%p653_p5), %v1110_v0  ;;  %239 = vst [vmem:[#allocation2 + $0x68] sm:$0xff] (!%p653_p5), %v1110_v0 }
  0x74   : > { %240 = vst [vmem:[#allocation2 + $0x70] sm:$0xff] %v1110_v0  ;;  %241 = vst [vmem:[#allocation2 + $0x78] sm:$0xff] %v1110_v0 }
  0x75 PF: > { %s654_s26 = sshll.u32 %s1087_s18, 7  ;;  %v242_v1 = vld [vmem:[%s1325_s23] sm:$0xff]  ;;  %v243_v27 = vld [vmem:[%s1325_s23 + $0x8] sm:$0xff]  ;;  %v244_v29 = vld [vmem:[%s1325_s23 + $0x10] sm:$0xff]  ;;  %p655_p4 = scmp.ne.s32.totalorder %s1087_s18, 1 }
  0x76   : > { %v250_v2 = vld [vmem:[%s1325_s23 + $0x40] sm:$0xff]  ;;  %728 = vmatprep.mubr.f32.mxu0 %v242_v1  ;;  %s1344_s29 = scalar_lea.vmem [#allocation6], %s654_s26  ;;  %v251_v28 = vld [vmem:[%s1325_s23 + $0x48] sm:$0xff]  ;;  %v252_v30 = vld [vmem:[%s1325_s23 + $0x50] sm:$0xff] }
  0x77   : > { %740 = vmatprep.mubr.f32.mxu1 %v250_v2  ;;  %v260_v3 = vld [vmem:[%s1344_s29] sm:$0xff]  ;;  %v261_v4 = vld [vmem:[%s1344_s29 + $0x8] sm:$0xff]  ;;  %v262_v5 = vld [vmem:[%s1344_s29 + $0x10] sm:$0xff] }
  0x78   : > { %v752_v6 = vpack.c.bf16 %v261_v4, %v260_v3  ;;  %v263_v7 = vld [vmem:[%s1344_s29 + $0x18] sm:$0xff]  ;;  %v264_v9 = vld [vmem:[%s1344_s29 + $0x20] sm:$0xff]  ;;  %v265_v10 = vld [vmem:[%s1344_s29 + $0x28] sm:$0xff] }
  0x79   : > { %v756_v8 = vpack.c.bf16 %v263_v7, %v262_v5  ;;  %v760_v11 = vpack.c.bf16 %v265_v10, %v264_v9  ;;  %v266_v12 = vld [vmem:[%s1344_s29 + $0x30] sm:$0xff]  ;;  %v267_v13 = vld [vmem:[%s1344_s29 + $0x38] sm:$0xff]  ;;  %v268_v15 = vld [vmem:[%s1344_s29 + $0x40] sm:$0xff] }
  0x7a   : > { %753 = vmatprep.subr.bf16.mxu0 %v752_v6  ;;  %784 = vmatprep.subr.bf16.mxu1 %v752_v6  ;;  %v764_v14 = vpack.c.bf16 %v267_v13, %v266_v12  ;;  %v269_v16 = vld [vmem:[%s1344_s29 + $0x48] sm:$0xff]  ;;  %v270_v18 = vld [vmem:[%s1344_s29 + $0x50] sm:$0xff]  ;;  %v271_v19 = vld [vmem:[%s1344_s29 + $0x58] sm:$0xff] }
  0x7b   : > { %755 = vmatpush3.bf16.msra.mxu0 %v752_v6  ;;  %792 = vmatpush3.bf16.msra.mxu1 %v752_v6  ;;  %v768_v17 = vpack.c.bf16 %v269_v16, %v268_v15  ;;  %v772_v20 = vpack.c.bf16 %v271_v19, %v270_v18  ;;  %v272_v21 = vld [vmem:[%s1344_s29 + $0x60] sm:$0xff]  ;;  %v273_v22 = vld [vmem:[%s1344_s29 + $0x68] sm:$0xff]  ;;  %v274_v24 = vld [vmem:[%s1344_s29 + $0x70] sm:$0xff] }
  0x7c   : > { %757 = vmatprep.subr.bf16.mxu0 %v756_v8  ;;  %785 = vmatprep.subr.bf16.mxu1 %v756_v8  ;;  %v776_v23 = vpack.c.bf16 %v273_v22, %v272_v21  ;;  %v275_v25 = vld [vmem:[%s1344_s29 + $0x78] sm:$0xff]  ;;  %v246_v33 = vld [vmem:[%s1325_s23 + $0x20] sm:$0xff]  ;;  %v247_v35 = vld [vmem:[%s1325_s23 + $0x28] sm:$0xff] }
  0x7d   : > { %v780_v26 = vpack.c.bf16 %v275_v25, %v274_v24  ;;  %v245_v31 = vld [vmem:[%s1325_s23 + $0x18] sm:$0xff]  ;;  %v254_v34 = vld [vmem:[%s1325_s23 + $0x60] sm:$0xff]  ;;  %v255_v36 = vld [vmem:[%s1325_s23 + $0x68] sm:$0xff] }
  0x7e   : > { %v253_v32 = vld [vmem:[%s1325_s23 + $0x58] sm:$0xff]  ;;  %v248_v37 = vld [vmem:[%s1325_s23 + $0x30] sm:$0xff]  ;;  %v277_v41 = vld [vmem:[#allocation2 + $0x8] sm:$0xff] }
  0x7f   : > { %759 = vmatpush3.bf16.msra.mxu0 %v756_v8  ;;  %793 = vmatpush3.bf16.msra.mxu1 %v756_v8  ;;  %v256_v38 = vld [vmem:[%s1325_s23 + $0x70] sm:$0xff]  ;;  %v249_v39 = vld [vmem:[%s1325_s23 + $0x38] sm:$0xff]  ;;  %v285_v42 = vld [vmem:[#allocation2 + $0x48] sm:$0xff] }
  0x80   : > { %761 = vmatprep.subr.bf16.mxu0 %v760_v11  ;;  %786 = vmatprep.subr.bf16.mxu1 %v760_v11  ;;  %v257_v40 = vld [vmem:[%s1325_s23 + $0x78] sm:$0xff]  ;;  %v276_v43 = vld [vmem:[#allocation2] sm:$0xff]  ;;  %v278_v55 = vld [vmem:[#allocation2 + $0x10] sm:$0xff] }
  0x81   : > { %v284_v44 = vld [vmem:[#allocation2 + $0x40] sm:$0xff]  ;;  %v279_v53 = vld [vmem:[#allocation2 + $0x18] sm:$0xff]  ;;  %v286_v56 = vld [vmem:[#allocation2 + $0x50] sm:$0xff] }
  0x82   : > { %v287_v54 = vld [vmem:[#allocation2 + $0x58] sm:$0xff]  ;;  %v281_v1 = vld [vmem:[#allocation2 + $0x28] sm:$0xff]  ;;  %v280_v3 = vld [vmem:[#allocation2 + $0x20] sm:$0xff] }
  0x83   : > { %763 = vmatpush3.bf16.msra.mxu0 %v760_v11  ;;  %794 = vmatpush3.bf16.msra.mxu1 %v760_v11  ;;  %v289_v2 = vld [vmem:[#allocation2 + $0x68] sm:$0xff]  ;;  %v288_v4 = vld [vmem:[#allocation2 + $0x60] sm:$0xff]  ;;  %v283_v13 = vld [vmem:[#allocation2 + $0x38] sm:$0xff] }
  0x84   : > { %765 = vmatprep.subr.bf16.mxu0 %v764_v14  ;;  %787 = vmatprep.subr.bf16.mxu1 %v764_v14  ;;  %v282_v15 = vld [vmem:[#allocation2 + $0x30] sm:$0xff] }
  0x85   : > { %v290_v16 = vld [vmem:[#allocation2 + $0x70] sm:$0xff] }
  0x87   : > { %767 = vmatpush3.bf16.msra.mxu0 %v764_v14  ;;  %795 = vmatpush3.bf16.msra.mxu1 %v764_v14  ;;  %v291_v14 = vld [vmem:[#allocation2 + $0x78] sm:$0xff] }
  0x88   : > { %769 = vmatprep.subr.bf16.mxu0 %v768_v17  ;;  %788 = vmatprep.subr.bf16.mxu1 %v768_v17 }
  0x8b   : > { %771 = vmatpush3.bf16.msra.mxu0 %v768_v17  ;;  %796 = vmatpush3.bf16.msra.mxu1 %v768_v17 }
  0x8c   : > { %773 = vmatprep.subr.bf16.mxu0 %v772_v20  ;;  %789 = vmatprep.subr.bf16.mxu1 %v772_v20 }
  0x8f   : > { %775 = vmatpush3.bf16.msra.mxu0 %v772_v20  ;;  %797 = vmatpush3.bf16.msra.mxu1 %v772_v20 }
  0x90   : > { %777 = vmatprep.subr.bf16.mxu0 %v776_v23  ;;  %790 = vmatprep.subr.bf16.mxu1 %v776_v23 }
  0x93   : > { %779 = vmatpush3.bf16.msra.mxu0 %v776_v23  ;;  %798 = vmatpush3.bf16.msra.mxu1 %v776_v23 }
  0x94   : > { %781 = vmatprep.subr.bf16.mxu0 %v780_v26  ;;  %791 = vmatprep.subr.bf16.mxu1 %v780_v26 }
  0x97   : > { %783 = vmatpush3.bf16.msra.mxu0 %v780_v26  ;;  %799 = vmatpush3.bf16.msra.mxu1 %v780_v26  ;;  %v656_v26 = vld [vmem:[%s1470_s2] ss:$0 sm:$0xff] (!%p655_p4) }
  0x9a   : > { %729 = vmatmul.mubr.f32.vlgmr.msra.gmra.mrb[0].mxu0 %v243_v27  ;;  %741 = vmatmul.mubr.f32.vlgmr.msra.gmra.mrb[0].mxu1 %v251_v28 }
  0x9b   : > { %731 = vmatprep.mubr.f32.mxu0 %v244_v29  ;;  %743 = vmatprep.mubr.f32.mxu1 %v252_v30 }
  0x9e   : > { %732 = vmatmul.mubr.f32.gmra.mrb[2].mxu0 %v245_v31  ;;  %744 = vmatmul.mubr.f32.gmra.mrb[2].mxu1 %v253_v32 }
  0x9f   : > { %734 = vmatprep.mubr.f32.mxu0 %v246_v33  ;;  %746 = vmatprep.mubr.f32.mxu1 %v254_v34 }
  0xa2   : > { %735 = vmatmul.mubr.f32.gmra.mrb[4].mxu0 %v247_v35  ;;  %747 = vmatmul.mubr.f32.gmra.mrb[4].mxu1 %v255_v36 }
  0xa3   : > { %737 = vmatprep.mubr.f32.mxu0 %v248_v37  ;;  %749 = vmatprep.mubr.f32.mxu1 %v256_v38 }
  0xa6   : > { %738 = vmatmul.mubr.f32.gmra.mrb[6].mxu0 %v249_v39  ;;  %750 = vmatmul.mubr.f32.gmra.mrb[6].mxu1 %v257_v40 }
 0x16d   : > { %v730_v45 = vpop.f32.mrb[0].mxu0  ;;  %v742_v46 = vpop.f32.mrb[0].mxu1 }
 0x16e   : > { %v438_v47 = vadd.f32 %v730_v45, %v277_v41  ;;  %v446_v48 = vadd.f32 %v742_v46, %v285_v42  ;;  %v358_v49 = vpop.f32.mrb[1].mxu0  ;;  %v398_v50 = vpop.f32.mrb[1].mxu1 }
 0x16f   : > { %v437_v51 = vadd.f32 %v358_v49, %v276_v43  ;;  %v445_v52 = vadd.f32 %v398_v50, %v284_v44 }
 0x170   : > { %454 = vst [vmem:[#allocation2 + $0x8] sm:$0xff] %v438_v47  ;;  %462 = vst [vmem:[#allocation2 + $0x48] sm:$0xff] %v446_v48 }
 0x171   : > { %453 = vst [vmem:[#allocation2] sm:$0xff] %v437_v51  ;;  %461 = vst [vmem:[#allocation2 + $0x40] sm:$0xff] %v445_v52  ;;  %v733_v57 = vpop.f32.mrb[2].mxu0  ;;  %v745_v58 = vpop.f32.mrb[2].mxu1 }
 0x172   : > { %v440_v59 = vadd.f32 %v733_v57, %v279_v53  ;;  %v448_v60 = vadd.f32 %v745_v58, %v287_v54  ;;  %v368_v61 = vpop.f32.mrb[3].mxu0  ;;  %v408_v62 = vpop.f32.mrb[3].mxu1 }
 0x173   : > { %v439_v63 = vadd.f32 %v368_v61, %v278_v55  ;;  %v447_v0 = vadd.f32 %v408_v62, %v286_v56 }
 0x174   : > { %456 = vst [vmem:[#allocation2 + $0x18] sm:$0xff] %v440_v59  ;;  %464 = vst [vmem:[#allocation2 + $0x58] sm:$0xff] %v448_v60 }
 0x175   : > { %455 = vst [vmem:[#allocation2 + $0x10] sm:$0xff] %v439_v63  ;;  %463 = vst [vmem:[#allocation2 + $0x50] sm:$0xff] %v447_v0  ;;  %v736_v5 = vpop.f32.mrb[4].mxu0  ;;  %v748_v6 = vpop.f32.mrb[4].mxu1 }
 0x176   : > { %v442_v7 = vadd.f32 %v736_v5, %v281_v1  ;;  %v450_v8 = vadd.f32 %v748_v6, %v289_v2  ;;  %v378_v9 = vpop.f32.mrb[5].mxu0  ;;  %v418_v10 = vpop.f32.mrb[5].mxu1 }
 0x177   : > { %v441_v11 = vadd.f32 %v378_v9, %v280_v3  ;;  %v449_v12 = vadd.f32 %v418_v10, %v288_v4  ;;  %472 = sbr.rel (%p655_p4) target bundleno = 393 (0x189), region = 48  ;;  %v474_v27 = vld [vmem:[#allocation2 + $0x8] sm:$0xff] (!%p655_p4) }
 0x178   : > { %458 = vst [vmem:[#allocation2 + $0x28] sm:$0xff] %v442_v7  ;;  %466 = vst [vmem:[#allocation2 + $0x68] sm:$0xff] %v450_v8  ;;  %v473_v25 = vld [vmem:[#allocation2] sm:$0xff] (!%p655_p4)  ;;  %v497_v29 = vadd.f32 (!%p655_p4), %v656_v26, %v474_v27  ;;  %v482_v43 = vld [vmem:[#allocation2 + $0x48] sm:$0xff] (!%p655_p4) }
 0x179   : > { %457 = vst [vmem:[#allocation2 + $0x20] sm:$0xff] %v441_v11  ;;  %465 = vst [vmem:[#allocation2 + $0x60] sm:$0xff] %v449_v12  ;;  %v739_v17 = vpop.f32.mrb[6].mxu0  ;;  %v751_v18 = vpop.f32.mrb[6].mxu1  ;;  %v496_v28 = vadd.f32 (!%p655_p4), %v656_v26, %v473_v25  ;;  %v481_v42 = vld [vmem:[#allocation2 + $0x40] sm:$0xff] (!%p655_p4)  ;;  %v505_v46 = vadd.f32 (!%p655_p4), %v656_v26, %v482_v43 }
 0x17a   : > { %v444_v19 = vadd.f32 %v739_v17, %v283_v13  ;;  %v452_v20 = vadd.f32 %v751_v18, %v291_v14  ;;  %v388_v21 = vpop.f32.mrb[7].mxu0  ;;  %v428_v22 = vpop.f32.mrb[7].mxu1  ;;  %513 = vst [vmem:[%s1338_s5 + $0x8] sm:$0xff] (!%p655_p4), %v497_v29  ;;  %v504_v45 = vadd.f32 (!%p655_p4), %v656_v26, %v481_v42 }
 0x17b   : > { %v443_v23 = vadd.f32 %v388_v21, %v282_v15  ;;  %v451_v24 = vadd.f32 %v428_v22, %v290_v16  ;;  %v476_v31 = vld [vmem:[#allocation2 + $0x18] sm:$0xff] (!%p655_p4)  ;;  %512 = vst [vmem:[%s1338_s5] sm:$0xff] (!%p655_p4), %v496_v28  ;;  %521 = vst [vmem:[%s1338_s5 + $0x48] sm:$0xff] (!%p655_p4), %v505_v46 }
 0x17c   : > { %460 = vst [vmem:[#allocation2 + $0x38] sm:$0xff] %v444_v19  ;;  %468 = vst [vmem:[#allocation2 + $0x78] sm:$0xff] %v452_v20  ;;  %v475_v30 = vld [vmem:[#allocation2 + $0x10] sm:$0xff] (!%p655_p4)  ;;  %v499_v34 = vadd.f32 (!%p655_p4), %v656_v26, %v476_v31  ;;  %v484_v48 = vld [vmem:[#allocation2 + $0x58] sm:$0xff] (!%p655_p4) }
 0x17d   : > { %459 = vst [vmem:[#allocation2 + $0x30] sm:$0xff] %v443_v23  ;;  %467 = vst [vmem:[#allocation2 + $0x70] sm:$0xff] %v451_v24  ;;  %v498_v33 = vadd.f32 (!%p655_p4), %v656_v26, %v475_v30  ;;  %v483_v44 = vld [vmem:[#allocation2 + $0x50] sm:$0xff] (!%p655_p4)  ;;  %v507_v51 = vadd.f32 (!%p655_p4), %v656_v26, %v484_v48 }
 0x17e   : > { %515 = vst [vmem:[%s1338_s5 + $0x18] sm:$0xff] %v499_v34  ;;  %v506_v47 = vadd.f32 %v656_v26, %v483_v44  ;;  %520 = vst [vmem:[%s1338_s5 + $0x40] sm:$0xff] %v504_v45 }
 0x17f   : > { %v478_v36 = vld [vmem:[#allocation2 + $0x28] sm:$0xff]  ;;  %514 = vst [vmem:[%s1338_s5 + $0x10] sm:$0xff] %v498_v33  ;;  %523 = vst [vmem:[%s1338_s5 + $0x58] sm:$0xff] %v507_v51 }
 0x180   : > { %v477_v32 = vld [vmem:[#allocation2 + $0x20] sm:$0xff]  ;;  %v501_v39 = vadd.f32 %v656_v26, %v478_v36  ;;  %v486_v50 = vld [vmem:[#allocation2 + $0x68] sm:$0xff]  ;;  %522 = vst [vmem:[%s1338_s5 + $0x50] sm:$0xff] %v506_v47 }
 0x181   : > { %v500_v35 = vadd.f32 %v656_v26, %v477_v32  ;;  %v485_v49 = vld [vmem:[#allocation2 + $0x60] sm:$0xff]  ;;  %v509_v53 = vadd.f32 %v656_v26, %v486_v50 }
 0x182   : > { %517 = vst [vmem:[%s1338_s5 + $0x28] sm:$0xff] %v501_v39  ;;  %v508_v52 = vadd.f32 %v656_v26, %v485_v49 }
 0x183   : > { %v480_v38 = vld [vmem:[#allocation2 + $0x38] sm:$0xff]  ;;  %516 = vst [vmem:[%s1338_s5 + $0x20] sm:$0xff] %v500_v35  ;;  %525 = vst [vmem:[%s1338_s5 + $0x68] sm:$0xff] %v509_v53 }
 0x184   : > { %v479_v37 = vld [vmem:[#allocation2 + $0x30] sm:$0xff]  ;;  %v503_v41 = vadd.f32 %v656_v26, %v480_v38  ;;  %v488_v55 = vld [vmem:[#allocation2 + $0x78] sm:$0xff]  ;;  %524 = vst [vmem:[%s1338_s5 + $0x60] sm:$0xff] %v508_v52 }
 0x185   : > { %v502_v40 = vadd.f32 %v656_v26, %v479_v37  ;;  %v487_v54 = vld [vmem:[#allocation2 + $0x70] sm:$0xff]  ;;  %v511_v57 = vadd.f32 %v656_v26, %v488_v55 }
 0x186   : > { %519 = vst [vmem:[%s1338_s5 + $0x38] sm:$0xff] %v503_v41  ;;  %v510_v56 = vadd.f32 %v656_v26, %v487_v54 }
 0x187   : > { %518 = vst [vmem:[%s1338_s5 + $0x30] sm:$0xff] %v502_v40  ;;  %527 = vst [vmem:[%s1338_s5 + $0x78] sm:$0xff] %v511_v57 }
 0x188   : > { %526 = vst [vmem:[%s1338_s5 + $0x70] sm:$0xff] %v510_v56 }
 0x189 PF: > { %s663_s18 = sshll.u32 %s1091_s19, 11  ;;  %s542_s24 = sshll.u32 %s1338_s5, 4  ;;  %s1403_s24 = int_to_ptr.vmem [resolvable:$true] %s542_s24 }
 0x18a   : > { %s1400_s28 = scalar_lea.hbm %s1471_s3, %s663_s18  ;;  %s1407_s1 = scalar_lea.sflag [#allocation5], %s217_s12 }
 0x18b   : > { %s977_s25 = scalar_lea.vmem %s1403_s24, 2048  ;;  %p1508_p3 = scmp.ne.s32.totalorder %s1491_s30, 0 }
 0x18c   : > { %p978_p2 = scmp.ne.s32.totalorder %s1403_s24, %s977_s25  ;;  %s1111_s19 = smov [#allocation8]  }
 0x18d   : > { %s981_s10 = sshll.u32 %s1111_s19, 4  ;;  %s982_s10 = int_to_ptr.vmem [resolvable:$false] %s981_s10 }
 0x18e   : > { %p979_p6 = pnand %p978_p2, %p1508_p3  ;;  %s983_s8 = scalar_lea.vmem %s982_s10, 4096 }
 0x18f   : > { %p984_p12 = scmp.lt.s32.totalorder %s1403_s24, %s982_s10  ;;  %p985_p0 = scmp.lt.s32.totalorder %s983_s8, %s977_s25 }
 0x190   : > { %p980_p10 = pneg %p979_p6 }
 0x191   : > { %p986_p8 = por %p985_p0, %p984_p12 }
 0x193   : > { %p987_p11 = pnand %p986_p8, %p980_p10 }
 0x195   : > { %990 = shalt.err (!%p987_p11)
}
 0x196   : > { %s991_s15 = scalar_lea.hbm %s1400_s28, 2048  ;;  %s995_s20 = scalar_lea.hbm %s1471_s3, 4096 }
 0x197   : > { %p992_p13 = scmp.ne.s32.totalorder %s1400_s28, %s991_s15  ;;  %p996_p1 = scmp.lt.u32.totalorder %s1400_s28, %s1471_s3 }
 0x198   : > { %p997_p5 = scmp.lt.u32.totalorder %s995_s20, %s991_s15  ;;  %p999_p2 = scmp.lt.u32.totalorder %s991_s15, %s1400_s28 }
 0x199   : > { %p993_p7 = pnand %p992_p13, %p1508_p3 }
 0x19a   : > { %p998_p4 = por %p997_p5, %p996_p1 }
 0x19b   : > { %p994_p9 = pneg %p993_p7 }
 0x19c   : > { %p1000_p6 = por %p999_p2, %p998_p4 }
 0x19e   : > { %p1001_p10 = pnand %p1000_p6, %p994_p9 }
 0x1a0   : > { %1004 = shalt.err (!%p1001_p10)
}
 0x1a1   : > { %s1112_s29 = smov 128   ;;  %s1113_s9 = smov 8  }
 0x1a2   : > { %806 = dma.vmem_to_hbm [thread:$0]  (%p1508_p3), %s1403_s24, 2048, %s1400_s28, %s1407_s1, %s1112_s29, %s1112_s29, %s1113_s9  }
 0x1a3 PF: > { %s1509_s11 = sld [smem:[#allocation12_spill]]  ;;  %s1510_s18 = sld [smem:[#allocation14_spill]] }
 0x1a4   : > { %p823_p12 = scmp.ge.s32.totalorder %s1103_s22, 2 }
 0x1a9   : > { %s557_s6 = sand.u32 1, %s1509_s11   ;;  %p1511_p0 = scmp.ne.s32.totalorder %s1510_s18, 0 }
 0x1aa   : > { %s558_s27 = scalar_lea.sflag [#allocation5], %s557_s6 }
 0x1ab   : > { %p817_p8 = pnand %p823_p12, %p1511_p0 }
 0x1ad   : > { %1058 = dma.done.wait (!%p817_p8), %s558_s27, 2048  }
 0x1ae   : > { %1060 = vsyncadd (!%p817_p8), %s558_s27, 4294965248  ;;  %s20_s22 = sadd.s32 1, %s1103_s22   ;;  %s1512_s18 = sld [smem:[#allocation13_spill]] }
 0x1af   : > { %p17_p11 = scmp.ge.s32.totalorder %s20_s22, 6   ;;  %s1513_s20 = sld [smem:[#allocation15_spill]] }
 0x1b0   : > { %s1514_s30 = sld [smem:[#allocation16_spill]]  ;;  %s1515_s12 = smov %s1067_s13 }
 0x1b1   : > { %s1516_s13 = smov %s1071_s14  ;;  %s1517_s14 = smov %s1285_s7 }
 0x1b2   : > { %s1518_s15 = smov %s1079_s16  ;;  %s1519_s16 = smov %s1083_s17 }
 0x1b3   : > { %s1520_s17 = smov %s1290_s4  ;;  %s1521_s19 = smov %s1099_s21 }
 0x1b4   :  { %19 = sbr.rel (!%p17_p11) target bundleno = 12 (0xc), region = 90 }
 0x1b6   : > { %s1522_s21 = smov %s1514_s30 }
 0x1bb   :  { %563 = vsyncpa [#allocation4], 1 }
 0x1bc   :  { %565 = vsyncpa [#allocation4 + $0x1], 1 }
 0x1bd   :  { %566 = vsyncpa [#allocation7], 1 }
 0x1be   :  { %567 = vsyncpa [#allocation5], 1 }
 0x1bf   :  { %569 = vsyncpa [#allocation5 + $0x1], 1 }

</bundles_post_ra>
